<compile_context>
chip_gen: v7x
topology: tpu7x:2x2x1
jax: 0.10.0
libtpu: 0.0.40
codegen_flags: <defaults>
</compile_context>

<pallas_src>
import functools

import jax
import jax.numpy as jnp
from jax.experimental import pallas as pl
from jax.experimental.pallas import tpu as pltpu

# Fits v7x's 64 MiB physical VMEM with headroom; well under v5e/v6e's 128 MiB.
_VMEM_LIMIT_BYTES = 48 * 1024 * 1024


# ---------------------------------------------------------------------------
# Pass 1: Wh = h @ W_pad and s12 = Wh @ [a1 a2]   (f32 accumulation on the MXU)
# ---------------------------------------------------------------------------
def wh_matmul_kernel(h_ref, w_ref, a12_ref, wh_ref, s12_ref):
    acc = jnp.dot(h_ref[...], w_ref[...], preferred_element_type=jnp.float32)
    wh_ref[...] = acc.astype(wh_ref.dtype)
    # Fold the attention projections into pass 1: avoids a second HBM read of h
    # and keeps the softmax logits exact f32 even when Wh is stored in bf16.
    s12_ref[...] = jnp.dot(acc, a12_ref[...], preferred_element_type=jnp.float32)


# ---------------------------------------------------------------------------
# Pass 2: flash-style masked softmax over key tiles, then attention @ Wh
# ---------------------------------------------------------------------------
def gat_attention_kernel(s1_ref, s2_ref, adj_ref, wh_ref, out_ref,
                         m_ref, l_ref, acc_ref, *, alpha, tile_k, wh_resident):
    ki = pl.program_id(1)

    @pl.when(ki == 0)
    def _init():
        m_ref[...] = jnp.full(m_ref.shape, -jnp.inf, jnp.float32)
        l_ref[...] = jnp.zeros(l_ref.shape, jnp.float32)
        acc_ref[...] = jnp.zeros(acc_ref.shape, jnp.float32)

    # Attention logits for this (TQ, TK) tile: broadcast add of the precomputed
    # query-/key-side projections (no transpose, no reductions), LeakyReLU, mask.
    e = s1_ref[...] + s2_ref[...]                          # (TQ,1)+(1,TK) -> (TQ,TK) f32
    e = jnp.where(e > 0, e, alpha * e)                     # LeakyReLU(alpha)
    # Compare the int8 adjacency directly (no int8->f32 convert on the VPU).
    masked = jnp.where(adj_ref[...] > 0, e, jnp.float32(-9e15))

    # Online softmax update (matches the reference exactly, incl. all-masked rows;
    # NOTE: padded key columns for non-multiple-of-8 N are masked like non-edges,
    # which only differs from the reference for rows with zero neighbors).
    m_prev = m_ref[...]
    m_new = jnp.maximum(m_prev, jnp.max(masked, axis=1, keepdims=True))
    corr = jnp.exp(m_prev - m_new)
    p = jnp.exp(masked - m_new)                            # 0 where masked (underflow)
    l_ref[...] = corr * l_ref[...] + jnp.sum(p, axis=1, keepdims=True)

    if wh_resident:
        # Wh is fully VMEM-resident (DMA'd once); slice the key tile in-kernel.
        k0 = pl.multiple_of(ki * tile_k, tile_k)
        wh_tile = wh_ref[pl.ds(k0, tile_k), :]
    else:
        wh_tile = wh_ref[...]
    acc_ref[...] = corr * acc_ref[...] + jnp.dot(
        p.astype(wh_tile.dtype), wh_tile, preferred_element_type=jnp.float32)
    m_ref[...] = m_new

    @pl.when(ki == pl.num_programs(1) - 1)
    def _finalize():
        h_prime = acc_ref[...] * pl.reciprocal(l_ref[...], approx=True)
        # ELU (exp goes to the otherwise-idle EUP slot; once per query tile).
        out_ref[...] = jnp.where(
            h_prime > 0, h_prime, jnp.exp(h_prime) - 1.0
        ).astype(out_ref.dtype)


# ---------------------------------------------------------------------------
# Wrapper
# ---------------------------------------------------------------------------
def _round_up(x, m):
    return ((x + m - 1) // m) * m


def _pick_tile(n, cap):
    """Largest multiple-of-8 divisor of n that is <= cap (n itself if n <= cap)."""
    if n <= cap:
        return n
    best, t, cap = 8, 8, min(cap, n)
    while t <= cap:
        if n % t == 0:
            best = t
        t += 8
    return best


def gat_forward(h, adj, W, a, alpha=0.2, compute_dtype=jnp.bfloat16,
                tile_q=None, tile_k=None, tile_m=None, wh_resident=None):
    """Pallas GAT layer: h (N,F_in), adj (N,N) dense, W (F_in,F_out), a (2*F_out,1).

    compute_dtype: dtype of the stored Wh / pass-2 MXU operands (bf16 default;
    logits, softmax state and accumulation stay f32). wh_resident: None = auto
    (keep Wh fully in VMEM when it fits), or force True/False.
    """
    N, f_in = h.shape
    f_out = W.shape[1]
    f_pad = _round_up(f_out, 128)                  # lane-dense output columns
    Np = _round_up(max(N, 8), 8)                   # sublane-granular node count

    h32 = h.astype(jnp.float32)
    W32 = W.astype(jnp.float32)
    if Np != N:
        h32 = jnp.zeros((Np, f_in), jnp.float32).at[:N].set(h32)
        adj = jnp.zeros((Np, Np), adj.dtype).at[:N, :N].set(adj)

    # Zero-padded weight so Wh / output are lane dense (extra cols stay 0).
    W_pad = jnp.zeros((f_in, f_pad), jnp.float32).at[:, :f_out].set(W32)
    # Both attention vectors packed into one (f_pad, 2) operand for pass 1.
    a12 = jnp.zeros((f_pad, 2), jnp.float32)
    a12 = a12.at[:f_out, 0].set(a[:f_out, 0].astype(jnp.float32))
    a12 = a12.at[:f_out, 1].set(a[f_out:, 0].astype(jnp.float32))

    # Adjacency shipped as int8 mask: 4x less HBM traffic on the dominant N*N term.
    adj_i8 = (adj > 0).astype(jnp.int8)

    tm = tile_m or _pick_tile(Np, 512)
    # Keep >= 2 query tiles when possible so the "parallel" qi axis can shard
    # across v7x's two TensorCores.
    tq = tile_q or _pick_tile(Np, min(512, max(Np // 2, 8)))
    tk = tile_k or _pick_tile(Np, 512)
    for t in (tm, tq, tk):
        assert Np % t == 0 and (t % 8 == 0 or t == Np), f"bad tile {t} for N={Np}"

    cd_bytes = jnp.dtype(compute_dtype).itemsize
    if wh_resident is None:
        # Budget check: resident Wh may be double-buffered by the pipeline.
        est = (2 * Np * f_pad * cd_bytes          # resident Wh
               + 3 * tq * tk                      # int8 adj tiles (Buffered(3))
               + 2 * tq * f_pad * 4               # output double buffer
               + tq * f_pad * 4                   # f32 accumulator scratch
               + 4 * (tq + tk) * 8)               # s1/s2/m/l
        wh_resident = est <= int(0.8 * _VMEM_LIMIT_BYTES)
    wh_resident = bool(wh_resident)

    n_k = Np // tk
    deep = n_k >= 3                               # deeper ki pipelining (helps v5e)

    cparams1 = pltpu.CompilerParams(
        dimension_semantics=("parallel",), vmem_limit_bytes=_VMEM_LIMIT_BYTES)
    cparams2 = pltpu.CompilerParams(
        dimension_semantics=("parallel", "arbitrary"),
        vmem_limit_bytes=_VMEM_LIMIT_BYTES)

    # ---- pass 1: Wh = h @ W_pad, s12 = Wh @ [a1 a2] ----
    wh, s12 = pl.pallas_call(
        wh_matmul_kernel,
        out_shape=(jax.ShapeDtypeStruct((Np, f_pad), compute_dtype),
                   jax.ShapeDtypeStruct((Np, 2), jnp.float32)),
        grid=(Np // tm,),
        in_specs=[pl.BlockSpec((tm, f_in), lambda i: (i, 0)),
                  pl.BlockSpec((f_in, f_pad), lambda i: (0, 0)),
                  pl.BlockSpec((f_pad, 2), lambda i: (0, 0))],
        out_specs=(pl.BlockSpec((tm, f_pad), lambda i: (i, 0)),
                   pl.BlockSpec((tm, 2), lambda i: (i, 0))),
        compiler_params=cparams1,
    )(h32, W_pad, a12)

    s1 = s12[:, 0:1]                              # (Np,1)  query side
    s2_row = s12[:, 1:2].reshape(1, Np)           # (1,Np)  key side, lane dense

    # ---- pass 2: masked online softmax + attention @ Wh ----
    if deep:
        adj_spec = pl.BlockSpec((tq, tk), lambda qi, ki: (qi, ki),
                                pipeline_mode=pl.Buffered(3))
    else:
        adj_spec = pl.BlockSpec((tq, tk), lambda qi, ki: (qi, ki))

    if wh_resident:
        # Constant index_map: Wh is DMA'd once and stays in VMEM for the whole grid.
        wh_spec = pl.BlockSpec((Np, f_pad), lambda qi, ki: (0, 0))
    elif deep:
        wh_spec = pl.BlockSpec((tk, f_pad), lambda qi, ki: (ki, 0),
                               pipeline_mode=pl.Buffered(3))
    else:
        wh_spec = pl.BlockSpec((tk, f_pad), lambda qi, ki: (ki, 0))

    out_pad = pl.pallas_call(
        functools.partial(gat_attention_kernel, alpha=float(alpha),
                          tile_k=tk, wh_resident=wh_resident),
        out_shape=jax.ShapeDtypeStruct((Np, f_pad), jnp.float32),
        grid=(Np // tq, n_k),
        in_specs=[
            pl.BlockSpec((tq, 1), lambda qi, ki: (qi, 0)),   # s1 (query side)
            pl.BlockSpec((1, tk), lambda qi, ki: (0, ki)),   # s2 (key side row)
            adj_spec,                                        # adjacency (int8)
            wh_spec,                                         # Wh (resident or tiled)
        ],
        out_specs=pl.BlockSpec((tq, f_pad), lambda qi, ki: (qi, 0)),
        scratch_shapes=[
            pltpu.VMEM((tq, 1), jnp.float32),       # running max
            pltpu.VMEM((tq, 1), jnp.float32),       # running denominator
            pltpu.VMEM((tq, f_pad), jnp.float32),   # f32 accumulator
        ],
        compiler_params=cparams2,
    )(s1, s2_row, adj_i8, wh)

    return out_pad[:N, :f_out]


# ---------------------------------------------------------------------------
# Reference + demo
# ---------------------------------------------------------------------------
def xavier_uniform(key, shape, gain):
    fan_in, fan_out = shape[0], shape[1]
    limit = gain * jnp.sqrt(6.0 / (fan_in + fan_out))
    return jax.random.uniform(key, shape, jnp.float32, -limit, limit)


def reference_forward(h, adj, W, a, alpha=0.2):
    """Pure-JAX reference mirroring the PyTorch module (dense adj path)."""
    f_out = W.shape[1]
    Wh = h @ W
    Wh1 = Wh @ a[:f_out, :]
    Wh2 = Wh @ a[f_out:, :]
    e = Wh1 + Wh2.T
    e = jnp.where(e > 0, e, alpha * e)
    masked = jnp.where(adj > 0, e, jnp.full_like(e, -9e15))
    attention = jax.nn.softmax(masked, axis=1)
    h_prime = attention @ Wh
    return jnp.where(h_prime > 0, h_prime, jnp.exp(h_prime) - 1.0)


if __name__ == "__main__":
    def make_case(key, n, f_in, f_out):
        k_h, k_adj, k_w, k_a = jax.random.split(key, 4)
        h = jax.random.normal(k_h, (n, f_in), jnp.float32)
        adj = (jax.random.uniform(k_adj, (n, n)) > 0.5).astype(jnp.float32)
        adj = jnp.maximum(adj, jnp.eye(n, dtype=jnp.float32))   # self-loops
        W = xavier_uniform(k_w, (f_in, f_out), gain=1.414)
        a = xavier_uniform(k_a, (2 * f_out, 1), gain=1.414)
        return h, adj, W, a

    alpha = 0.2
    k1, k2, k3 = jax.random.split(jax.random.PRNGKey(0), 3)

    # Case 1: tiny single-tile problem (N=8, F_in=16, F_out=32). Default bf16
    # operands, exact-f32 variant, and the streamed-Wh fallback path.
    h, adj, W, a = make_case(k1, 8, 16, 32)
    ref = reference_forward(h, adj, W, a, alpha=alpha)
    out_bf16 = gat_forward(h, adj, W, a, alpha=alpha)
    out_f32 = gat_forward(h, adj, W, a, alpha=alpha, compute_dtype=jnp.float32)
    out_stream = gat_forward(h, adj, W, a, alpha=alpha,
                             compute_dtype=jnp.float32, wh_resident=False)
    jax.block_until_ready((out_bf16, out_f32, out_stream))
    assert out_bf16.shape == ref.shape
    assert jnp.allclose(out_bf16, ref, atol=1e-1, rtol=1e-1), "bf16 small mismatch"
    assert jnp.allclose(out_f32, ref, atol=2e-2, rtol=2e-2), "f32 small mismatch"
    assert jnp.allclose(out_stream, ref, atol=2e-2, rtol=2e-2), "streamed-Wh mismatch"

    # Case 2: multi-tile grid (N=256) exercising the online softmax across key
    # tiles (and Buffered(3) adjacency pipelining in the explicit-tile variant).
    h, adj, W, a = make_case(k2, 256, 64, 32)
    ref = reference_forward(h, adj, W, a, alpha=alpha)
    out_bf16 = gat_forward(h, adj, W, a, alpha=alpha)                    # auto tiles
    out_f32 = gat_forward(h, adj, W, a, alpha=alpha, compute_dtype=jnp.float32,
                          tile_q=64, tile_k=64, tile_m=128)              # 4 key tiles
    jax.block_until_ready((out_bf16, out_f32))
    assert jnp.allclose(out_bf16, ref, atol=1e-1, rtol=1e-1), "bf16 tiled mismatch"
    assert jnp.allclose(out_f32, ref, atol=2e-2, rtol=2e-2), "f32 tiled mismatch"

    # Case 3: N not a multiple of 8 and F_out not a multiple of 128 (padding path).
    h, adj, W, a = make_case(k3, 100, 48, 20)
    ref = reference_forward(h, adj, W, a, alpha=alpha)
    out = gat_forward(h, adj, W, a, alpha=alpha, compute_dtype=jnp.float32)
    jax.block_until_ready(out)
    assert out.shape == ref.shape
    assert jnp.allclose(out, ref, atol=2e-2, rtol=2e-2), "padded-N mismatch"

    # TODO(synk): torch.sparse adjacency branch (torch.sparse.softmax) is not
    # implemented; only the dense-adj path of the PyTorch module is reproduced.
    print("KERNEL_OK")
</pallas_src>

<mosaic_0001>
module attributes {stable_mosaic.version = 11 : i64} {
  func.func @wh_matmul_kernel(%arg0: i32, %arg1: memref<8x16xf32, #tpu.memory_space<vmem>>, %arg2: memref<16x128xf32, #tpu.memory_space<vmem>>, %arg3: memref<128x2xf32, #tpu.memory_space<vmem>>, %arg4: memref<8x128xbf16, #tpu.memory_space<vmem>>, %arg5: memref<8x2xf32, #tpu.memory_space<vmem>>) attributes {dimension_semantics = [#tpu.dimension_semantics<parallel>], iteration_bounds = array<i64: 1>, scalar_prefetch = 0 : i64, scratch_operands = 0 : i64, tpu.core_type = #tpu.core_type<tc>, window_params = [{transform_indices = @transform_0, window_bounds = array<i64: 8, 16>}, {pipeline_mode = #tpu.pipeline_mode<synchronous>, transform_indices = @transform_1, window_bounds = array<i64: 16, 128>}, {pipeline_mode = #tpu.pipeline_mode<synchronous>, transform_indices = @transform_2, window_bounds = array<i64: 128, 2>}, {transform_indices = @transform_3, window_bounds = array<i64: 8, 128>}, {transform_indices = @transform_4, window_bounds = array<i64: 8, 2>}]} {
    %c0 = arith.constant 0 : index
    %c0_0 = arith.constant 0 : index
    %0 = vector.load %arg1[%c0, %c0_0] : memref<8x16xf32, #tpu.memory_space<vmem>>, vector<8x16xf32>
    %c0_1 = arith.constant 0 : index
    %c0_2 = arith.constant 0 : index
    %1 = vector.load %arg2[%c0_1, %c0_2] : memref<16x128xf32, #tpu.memory_space<vmem>>, vector<16x128xf32>
    %cst = arith.constant dense<0.000000e+00> : vector<8x128xf32>
    %2 = tpu.matmul %0, %1, %cst {dimension_numbers = #tpu.dot_dimension_numbers<[1], [0], [0], [1], [0, 0, 1, 1], [], []>} : vector<8x16xf32>, vector<16x128xf32>, vector<8x128xf32> -> vector<8x128xf32>
    %3 = arith.truncf %2 : vector<8x128xf32> to vector<8x128xbf16>
    %c0_3 = arith.constant 0 : index
    %c0_4 = arith.constant 0 : index
    %4 = vector.load %arg4[%c0_3, %c0_4] : memref<8x128xbf16, #tpu.memory_space<vmem>>, vector<8x128xbf16>
    tpu.vector_store %arg4[%c0_3, %c0_4], %3 {strides = array<i32>} : memref<8x128xbf16, #tpu.memory_space<vmem>>, vector<8x128xbf16>,
    %c0_5 = arith.constant 0 : index
    %c0_6 = arith.constant 0 : index
    %5 = vector.load %arg3[%c0_5, %c0_6] : memref<128x2xf32, #tpu.memory_space<vmem>>, vector<128x2xf32>
    %cst_7 = arith.constant dense<0.000000e+00> : vector<8x2xf32>
    %6 = tpu.matmul %2, %5, %cst_7 {dimension_numbers = #tpu.dot_dimension_numbers<[1], [0], [0], [1], [0, 0, 1, 1], [], []>} : vector<8x128xf32>, vector<128x2xf32>, vector<8x2xf32> -> vector<8x2xf32>
    %c0_8 = arith.constant 0 : index
    %c0_9 = arith.constant 0 : index
    %7 = vector.load %arg5[%c0_8, %c0_9] : memref<8x2xf32, #tpu.memory_space<vmem>>, vector<8x2xf32>
    tpu.vector_store %arg5[%c0_8, %c0_9], %6 {strides = array<i32>} : memref<8x2xf32, #tpu.memory_space<vmem>>, vector<8x2xf32>,
    return
  }
  func.func @transform_0(%arg0: i32) -> (i32, i32) {
    %c0_i32 = arith.constant 0 : i32
    %c0_i32_0 = arith.constant 0 : i32
    return %arg0, %c0_i32 : i32, i32
  }
  func.func @transform_1(%arg0: i32) -> (i32, i32) {
    %c0_i32 = arith.constant 0 : i32
    %c0_i32_0 = arith.constant 0 : i32
    %c0_i32_1 = arith.constant 0 : i32
    return %c0_i32, %c0_i32_0 : i32, i32
  }
  func.func @transform_2(%arg0: i32) -> (i32, i32) {
    %c0_i32 = arith.constant 0 : i32
    %c0_i32_0 = arith.constant 0 : i32
    %c0_i32_1 = arith.constant 0 : i32
    return %c0_i32, %c0_i32_0 : i32, i32
  }
  func.func @transform_3(%arg0: i32) -> (i32, i32) {
    %c0_i32 = arith.constant 0 : i32
    %c0_i32_0 = arith.constant 0 : i32
    return %arg0, %c0_i32 : i32, i32
  }
  func.func @transform_4(%arg0: i32) -> (i32, i32) {
    %c0_i32 = arith.constant 0 : i32
    %c0_i32_0 = arith.constant 0 : i32
    return %arg0, %c0_i32 : i32, i32
  }
}

</mosaic_0001>

<bundles_post_ra>
// kernel: tpu_custom_call.1
= control target key start
LH: loop header
LB: loop body
LE: loop exit
PB: predicated region body
PF: predicated region fallthrough
CT: control target
= control target key end

     0   :  { %v320_v2 = vmov 0.0|0.0   ;;  %vm321_vm0 = vmmov 0   ;;  %v322_v4 = vmov 0.0   ;;  %vm20_vm1 = vcmask 130048   ;;  %s421_s0 = inlined_call_operand.vmem [shape: f32[8,16], index: 0, kind: input, shape index: {}]   ;;  %s422_s1 = inlined_call_operand.vmem [shape: f32[16,128], index: 1, kind: input, shape index: {}]   ;;  %s423_s2 = inlined_call_operand.vmem [shape: f32[128,2], index: 2, kind: input, shape index: {}]   ;;  %s424_s3 = inlined_call_operand.hbm [shape: bf16[8,128], index: 3, kind: output, shape index: {0}]   ;;  %s425_s4 = inlined_call_operand.vmem [shape: f32[8,2], index: 4, kind: output, shape index: {1}]  }
   0x1   :  { %v18_v0 = vld [vmem:[%s422_s1] sm:$0xff]  ;;  %v19_v1 = vld [vmem:[%s422_s1 + $0x8] sm:$0xff]  ;;  %265 = vmatprep.subr.bf16.mxu0 %v320_v2  ;;  %227 = vmatprep.mubr.msk.f32.mxu0 %vm321_vm0, %v322_v4  ;;  %v98_v7 = vld [vmem:[%s423_s2 + $0x10] sm:$0xff] }
   0x2   :  { %v266_v3 = vpack.c.bf16 %v19_v1, %v18_v0  ;;  %v96_v5 = vld [vmem:[%s423_s2] sm:$0xff]  ;;  %v97_v6 = vld [vmem:[%s423_s2 + $0x8] sm:$0xff]  ;;  %268 = vmatprep.subr.bf16.mxu1 %v320_v2  ;;  %v99_v9 = vld [vmem:[%s423_s2 + $0x18] sm:$0xff]  ;;  %262 = vmatprep.mubr.msk.f32.mxu1 %vm321_vm0, %v322_v4 }
   0x3   :  { %v269_v8 = vpack.c.bf16 %v97_v6, %v96_v5  ;;  %v17_v10 = vld [vmem:[%s421_s0] sm:$0xff]  ;;  %v272_v11 = vpack.c.bf16 %v99_v9, %v98_v7  ;;  %v101_v13 = vld [vmem:[%s423_s2 + $0x28] sm:$0xff] }
   0x4   :  { %267 = vmatpush3.bf16.msra.mxu0 %v266_v3  ;;  %v100_v12 = vld [vmem:[%s423_s2 + $0x20] sm:$0xff] }
   0x5   :  { %270 = vmatpush3.bf16.msra.mxu1 %v269_v8 }
   0x6   :  { %271 = vmatprep.subr.bf16.mxu1 %v320_v2 }
   0x7   :  { %228 = vmatmul.mubr.msk.f32.vlgmr.msra.gmra.mrb[0].mxu0 %vm20_vm1, %v17_v10 }
   0x8   :  { %10 = vsyncpa [#allocation3], 0  ;;  %v275_v14 = vpack.c.bf16 %v101_v13, %v100_v12  ;;  %v102_v15 = vld [vmem:[%s423_s2 + $0x30] sm:$0xff]  ;;  %v103_v16 = vld [vmem:[%s423_s2 + $0x38] sm:$0xff]  ;;  %s323_s1 = smov [#allocation2]  }
   0x9   :  { %273 = vmatpush3.bf16.msra.mxu1 %v272_v11  ;;  %v278_v17 = vpack.c.bf16 %v103_v16, %v102_v15  ;;  %v104_v18 = vld [vmem:[%s423_s2 + $0x40] sm:$0xff]  ;;  %v105_v19 = vld [vmem:[%s423_s2 + $0x48] sm:$0xff]  ;;  %v106_v21 = vld [vmem:[%s423_s2 + $0x50] sm:$0xff]  ;;  %s190_s25 = sshll.u32 %s323_s1, 4  ;;  %s191_s25 = int_to_ptr.vmem [resolvable:$true] %s190_s25 }
   0xa   :  { %274 = vmatprep.subr.bf16.mxu1 %v320_v2  ;;  %v281_v20 = vpack.c.bf16 %v105_v19, %v104_v18  ;;  %v107_v22 = vld [vmem:[%s423_s2 + $0x58] sm:$0xff]  ;;  %v108_v24 = vld [vmem:[%s423_s2 + $0x60] sm:$0xff]  ;;  %v109_v25 = vld [vmem:[%s423_s2 + $0x68] sm:$0xff]  ;;  %s296_s26 = scalar_lea.vmem %s191_s25, 64  ;;  %p301_p1 = scmp.lt.s32.totalorder %s191_s25, %s191_s25 }
   0xb   :  { %v284_v23 = vpack.c.bf16 %v107_v22, %v106_v21  ;;  %v287_v26 = vpack.c.bf16 %v109_v25, %v108_v24  ;;  %v110_v27 = vld [vmem:[%s423_s2 + $0x70] sm:$0xff]  ;;  %v111_v28 = vld [vmem:[%s423_s2 + $0x78] sm:$0xff]  ;;  %p297_p0 = scmp.ne.s32.totalorder %s191_s25, %s296_s26  ;;  %p302_p2 = scmp.lt.s32.totalorder %s296_s26, %s296_s26 }
   0xc   :  { %v290_v29 = vpack.c.bf16 %v111_v28, %v110_v27 }
   0xd   :  { %276 = vmatpush3.bf16.msra.mxu1 %v275_v14  ;;  %p303_p3 = por %p302_p2, %p301_p1 }
   0xe   :  { %277 = vmatprep.subr.bf16.mxu1 %v320_v2 }
   0xf   :  { %p304_p4 = pnand %p303_p3, %p297_p0 }
  0x11   :  { %279 = vmatpush3.bf16.msra.mxu1 %v278_v17 }
  0x12   :  { %280 = vmatprep.subr.bf16.mxu1 %v320_v2 }
  0x15   :  { %282 = vmatpush3.bf16.msra.mxu1 %v281_v20 }
  0x16   :  { %283 = vmatprep.subr.bf16.mxu1 %v320_v2 }
  0x19   :  { %285 = vmatpush3.bf16.msra.mxu1 %v284_v23 }
  0x1a   :  { %286 = vmatprep.subr.bf16.mxu1 %v320_v2 }
  0x1d   :  { %288 = vmatpush3.bf16.msra.mxu1 %v287_v26 }
  0x1e   :  { %289 = vmatprep.subr.bf16.mxu1 %v320_v2 }
  0x21   :  { %291 = vmatpush3.bf16.msra.mxu1 %v290_v29 }
  0xda   :  { %v90_v30 = vpop.f32.mrb[0].mxu0 }
  0xdb   :  { %v94_v31 = vpack.c.bf16 %v90_v30, %v90_v30  ;;  %v229_v32 = vpop.f32.mrb[1].mxu0  ;;  %263 = vmatmul.mubr.f32.vlgmr.msra.gmra.mrb[0].mxu1 %v90_v30 }
  0xdd   :  { %95 = vst [vmem:[#allocation2] sm:$0xf] %v94_v31 }
  0xde   :  { %307 = shalt.err (!%p304_p4)
}
  0xdf   :  { %s308_s28 = scalar_lea.hbm %s424_s3, 64 }
  0xe0   :  { %p309_p5 = scmp.ne.s32.totalorder %s424_s3, %s308_s28  ;;  %p312_p6 = scmp.lt.u32.totalorder %s308_s28, %s424_s3 }
  0xe2   :  { %p314_p7 = pnand %p312_p6, %p309_p5 }
  0xe4   :  { %317 = shalt.err (!%p314_p7)
}
  0xe5   :  { %193 = dma.vmem_to_hbm [thread:$0]  %s191_s25, 64, %s424_s3, [#allocation3]   ;;  %vm182_vm2 = vcmask 15360  }
 0x1ae   :  { %v178_v33 = vpop.f32.mrb[0].mxu1 }
 0x1af   :  { %183 = vst.msk [vmem:[%s425_s4] sm:$0xff] %vm182_vm2, %v178_v33  ;;  %v264_v34 = vpop.f32.mrb[1].mxu1 }
 0x1b0   :  { %318 = dma.done.wait [#allocation3], 64  }
 0x1b1   :  { %319 = vsyncadd [#allocation3], 4294967232 }
 0x1b2   :  { %201 = vsyncpa [#allocation3], 1 }

</bundles_post_ra>
